<compile_context>
chip_gen: v6e
topology: v6e:2x2x1
jax: 0.10.0
libtpu: 0.0.40
codegen_flags: <defaults>
</compile_context>

<pallas_src>
import jax
import jax.numpy as jnp
from jax.experimental import pallas as pl
from jax.experimental.pallas import tpu as pltpu


def _round_up(x: int, m: int) -> int:
    return (x + m - 1) // m * m


def _unet_classifier_kernel(x_ref, w_ref, o_ref):
    # x_ref: [1, C, TL]   one (batch, L-tile) slab of the NCL input
    # w_ref: [Kp, C]      1x1-conv weight, native PyTorch [out_ch, in_ch] layout
    # o_ref: [1, Kp, TL]  output tile in (B, K, L) layout -- lane-dense store,
    #                     no transpose anywhere in the kernel.
    o_ref[0] = jnp.dot(
        w_ref[...], x_ref[0], preferred_element_type=jnp.float32
    ).astype(o_ref.dtype)


def unet_classifier_forward(x, weight, *, tl_max=4096):
    """Pallas equivalent of `unet_classifier.forward`.

    x:      [B, 64, L]                                 activations (N, C, L)
    weight: [n_classes, 64, 1, 1] or [n_classes, 64]   Conv2d 1x1 weight, no bias
    returns [B, L, n_classes]
    """
    B, C, L = x.shape
    w2 = weight.reshape(weight.shape[0], C)
    n_classes = w2.shape[0]

    # Class axis: pad only to a sublane multiple (8).  The output block covers
    # the full K dim, so the store stays unmasked along lanes (last dim = TL).
    kp = _round_up(n_classes, 8)
    if kp != n_classes:
        w2 = jnp.pad(w2, ((0, kp - n_classes), (0, 0)))

    # Sequence tile: multiple of 128, as large as tl_max.  No padded copy of x;
    # a ragged last tile is handled by the cdiv grid (OOB output cols masked).
    tl = min(tl_max, _round_up(L, 128))
    num_l = pl.cdiv(L, tl)
    # v7x megacore: keep >= 2 parallel grid steps when the problem allows it.
    if B * num_l < 2 and L > 128:
        tl = max(128, _round_up(pl.cdiv(L, 2), 128))
        num_l = pl.cdiv(L, tl)

    grid = (B, num_l)
    itemsize = jnp.dtype(x.dtype).itemsize

    out = pl.pallas_call(
        _unet_classifier_kernel,
        out_shape=jax.ShapeDtypeStruct((B, kp, L), x.dtype),
        grid_spec=pl.GridSpec(
            grid=grid,
            in_specs=[
                pl.BlockSpec((1, C, tl), lambda b, j: (b, 0, j)),  # x tile
                pl.BlockSpec((kp, C), lambda b, j: (0, 0)),        # weight, resident
            ],
            out_specs=pl.BlockSpec((1, kp, tl), lambda b, j: (b, 0, j)),
        ),
        compiler_params=pltpu.CompilerParams(
            dimension_semantics=("parallel", "parallel"),
        ),
        cost_estimate=pl.CostEstimate(
            flops=2 * B * L * C * kp,
            transcendentals=0,
            bytes_accessed=(B * C * L * itemsize        # x read
                            + kp * C * itemsize          # weight read
                            + B * kp * L * itemsize),    # output write
        ),
    )(x, w2)

    # Module's permute(0, 2, 1) + strip the tiny sublane padding (cheap XLA
    # pass over B*L*K elements, ~K/C of the input traffic).
    return jnp.transpose(out[:, :n_classes, :], (0, 2, 1))


if __name__ == "__main__":
    key = jax.random.PRNGKey(0)
    k_x, k_w = jax.random.split(key)

    B, C, L = 2, 64, 256          # module fixes in_channels = 64
    n_classes = 16

    x = jax.random.normal(k_x, (B, C, L), jnp.float32)
    # PyTorch Conv2d weight layout [out_ch, in_ch, 1, 1], U(-1/sqrt(fan_in), ..)
    bound = 1.0 / jnp.sqrt(jnp.asarray(C, jnp.float32))
    weight = jax.random.uniform(k_w, (n_classes, C, 1, 1), jnp.float32, -bound, bound)

    out = unet_classifier_forward(x, weight)
    out = jax.block_until_ready(out)

    # Plain-JAX reference of the PyTorch semantics: 1x1 conv + squeeze + permute.
    ref = jnp.einsum("bcl,kc->blk", x, weight.reshape(n_classes, C))

    assert out.shape == (B, L, n_classes)
    # Loose-ish tolerance: Pallas MXU and the XLA reference may use different
    # f32 matmul pass counts; structural/layout bugs would be O(1) errors.
    assert jnp.allclose(out, ref, atol=1e-2, rtol=1e-2)

    print("KERNEL_OK")
</pallas_src>

<mosaic_0001>
module attributes {stable_mosaic.version = 11 : i64} {
  func.func @_unet_classifier_kernel(%arg0: i32, %arg1: i32, %arg2: memref<1x64x256xf32, #tpu.memory_space<vmem>>, %arg3: memref<16x64xf32, #tpu.memory_space<vmem>>, %arg4: memref<1x16x256xf32, #tpu.memory_space<vmem>>) attributes {dimension_semantics = [#tpu.dimension_semantics<parallel>, #tpu.dimension_semantics<parallel>], iteration_bounds = array<i64: 2, 1>, scalar_prefetch = 0 : i64, scratch_operands = 0 : i64, tpu.core_type = #tpu.core_type<tc>, window_params = [{transform_indices = @transform_0, window_bounds = array<i64: 1, 64, 256>}, {pipeline_mode = #tpu.pipeline_mode<synchronous>, transform_indices = @transform_1, window_bounds = array<i64: 16, 64>}, {transform_indices = @transform_2, window_bounds = array<i64: 1, 16, 256>}]} {
    %c0 = arith.constant 0 : index
    %c0_0 = arith.constant 0 : index
    %0 = vector.load %arg3[%c0, %c0_0] : memref<16x64xf32, #tpu.memory_space<vmem>>, vector<16x64xf32>
    %c0_1 = arith.constant 0 : index
    %c0_2 = arith.constant 0 : index
    %c0_3 = arith.constant 0 : index
    %1 = vector.load %arg2[%c0_1, %c0_2, %c0_3] : memref<1x64x256xf32, #tpu.memory_space<vmem>>, vector<1x64x256xf32>
    %2 = vector.shape_cast %1 : vector<1x64x256xf32> to vector<64x256xf32>
    %cst = arith.constant dense<0.000000e+00> : vector<16x256xf32>
    %3 = tpu.matmul %0, %2, %cst {dimension_numbers = #tpu.dot_dimension_numbers<[1], [0], [0], [1], [0, 0, 1, 1], [], []>} : vector<16x64xf32>, vector<64x256xf32>, vector<16x256xf32> -> vector<16x256xf32>
    %c0_4 = arith.constant 0 : index
    %c0_5 = arith.constant 0 : index
    %c0_6 = arith.constant 0 : index
    %4 = vector.load %arg4[%c0_4, %c0_5, %c0_6] : memref<1x16x256xf32, #tpu.memory_space<vmem>>, vector<1x16x256xf32>
    %5 = vector.shape_cast %4 : vector<1x16x256xf32> to vector<16x256xf32>
    %6 = vector.shape_cast %3 : vector<16x256xf32> to vector<1x16x256xf32>
    tpu.vector_store %arg4[%c0_4, %c0_5, %c0_6], %6 {strides = array<i32>} : memref<1x16x256xf32, #tpu.memory_space<vmem>>, vector<1x16x256xf32>,
    return
  }
  func.func @transform_0(%arg0: i32, %arg1: i32) -> (i32, i32, i32) {
    %c0_i32 = arith.constant 0 : i32
    %c0_i32_0 = arith.constant 0 : i32
    return %arg0, %c0_i32, %arg1 : i32, i32, i32
  }
  func.func @transform_1(%arg0: i32, %arg1: i32) -> (i32, i32) {
    %c0_i32 = arith.constant 0 : i32
    %c0_i32_0 = arith.constant 0 : i32
    %c0_i32_1 = arith.constant 0 : i32
    return %c0_i32, %c0_i32_0 : i32, i32
  }
  func.func @transform_2(%arg0: i32, %arg1: i32) -> (i32, i32, i32) {
    %c0_i32 = arith.constant 0 : i32
    %c0_i32_0 = arith.constant 0 : i32
    return %arg0, %c0_i32, %arg1 : i32, i32, i32
  }
}

</mosaic_0001>

<bundles_post_ra>
// kernel: tpu_custom_call.1
= control target key start
LH: loop header
LB: loop body
LE: loop exit
PB: predicated region body
PF: predicated region fallthrough
CT: control target
= control target key end

     0   :  { %7 = vsyncpa [#allocation3], 0  ;;  %s898_s0 = inlined_call_operand.hbm [shape: f32[2,64,256], index: 0, kind: input, shape index: {}]   ;;  %s899_s1 = inlined_call_operand.hbm [shape: f32[16,64], index: 1, kind: input, shape index: {}]   ;;  %s900_s2 = inlined_call_operand.hbm [shape: f32[2,16,256], index: 2, kind: output, shape index: {}]  }
   0x1   :  { %9 = vsyncpa [#allocation3 + $0x1], 0 }
   0x2   :  { %10 = vsyncpa [#allocation6], 0 }
   0x3   :  { %11 = vsyncpa [#allocation4], 0 }
   0x4   :  { %13 = vsyncpa [#allocation4 + $0x1], 0  ;;  %s698_s9 = smov 0   ;;  %s700_s10 = smov 0  }
   0x5   :  { %s702_s11 = smov 0   ;;  %s704_s12 = smov 0  }
   0x6   :  { %s706_s13 = smov 0   ;;  %s708_s14 = smov 0  }
   0x7 LB: > { %s416_s15 = sadd.s32 4294967295, %s671_s14   ;;  %s417_s16 = sadd.s32 4294967294, %s671_s14   ;;  %s671_s14 = sphi %s708_s14, %s19_s14   ;;  %s667_s13 = sphi %s706_s13, %s918_s13   ;;  %s663_s12 = sphi %s704_s12, %s917_s12   ;;  %s659_s11 = sphi %s702_s11, %s916_s11   ;;  %s655_s10 = sphi %s700_s10, %s915_s10   ;;  %s651_s9 = sphi %s698_s9, %s914_s9  }
   0x8   : > { %p53_p0 = scmp.ne.s32.totalorder %s655_s10, %s651_s9  ;;  %p732_p1 = scmp.eq.s32.totalorder %s416_s15, 0 }
   0x9   : > { %p736_p2 = scmp.eq.s32.totalorder %s416_s15, 1  ;;  %p106_p3 = scmp.eq.s32.totalorder %s417_s16, 1 }
   0xa   : > { %p742_p4 = por %p732_p1, %p53_p0  ;;  %p418_p5 = scmp.ge.s32.totalorder %s671_s14, 1 }
   0xb   : > { %p747_p6 = por %p106_p3, %p53_p0  ;;  %p113_p7 = scmp.lt.s32.totalorder %s671_s14, 3 }
   0xc   : > { %s904_s19 = scalar_select %p742_p4, 1, 0 }
   0xd   : > { %s905_s20 = scalar_select %p747_p6, 1, 0 }
   0xe   : > { %p752_p8 = pnand %p418_p5, %p113_p7  ;;  %s673_s22 = smov [#allocation5]  }
   0xf   : > { %s125_s23 = sshll.u32 %s673_s22, 4  ;;  %s31_s25 = sadd.s32 1, %s667_s13  ;;  %s126_s23 = int_to_ptr.vmem [resolvable:$true] %s125_s23 }
  0x10   : > { %p461_p9 = pneg %p752_p8  ;;  %s544_s26 = scalar_lea.vmem %s126_s23, 256 }
  0x11   : > { %p545_p13 = scmp.ne.s32.totalorder %s126_s23, %s544_s26  ;;  %p552_p5 = scmp.lt.s32.totalorder %s126_s23, %s126_s23 }
  0x12   : > { %p761_p11 = pnand %p461_p9, %p732_p1  ;;  %p553_p7 = scmp.lt.s32.totalorder %s544_s26, %s544_s26 }
  0x14   : > { %p535_p12 = pneg %p761_p11  ;;  %p554_p6 = por %p553_p7, %p552_p5 }
  0x16   : > { %p547_p0 = pnand %p545_p13, %p535_p12 }
  0x18   : > { %p548_p3 = pneg %p547_p0 }
  0x1a   : > { %p555_p4 = pnand %p554_p6, %p548_p3 }
  0x1c   : > { %558 = shalt.err (!%p555_p4)
}
  0x1d   : > { %s674_s27 = smov 128   ;;  %s675_s28 = smov 8  }
  0x1e   : > { %464 = dma.hbm_to_vmem [thread:$0]  (!%p761_p11), %s899_s1, 256, %s126_s23, [#allocation6], %s674_s27, %s674_s27, %s675_s28  }
  0x1f   : > { %p33_p6 = scmp.ge.s32.totalorder %s31_s25, 2  ;;  %s40_s3 = sadd.s32 1, %s659_s11 }
  0x20   : > { %p47_p4 = scmp.ne.s32.totalorder %s659_s11, %s655_s10  ;;  %p48_p9 = scmp.eq.s32.totalorder %s671_s14, 0 }
  0x21   : > { %s920_s25 = smov (%p33_p6, %s31_s25), 0  ;;  %p474_p0 = scmp.lt.s32.totalorder %s671_s14, 2 }
  0x22   : > { %p779_p12 = por %p48_p9, %p47_p4  ;;  %p785_p13 = por %p736_p2, %p47_p4 }
  0x23   : > { %s35_s6 = ssub.s32 %s667_s13, %s920_s25  ;;  %s139_s7 = sand.u32 1, %s659_s11  }
  0x24   : > { %p38_p11 = scmp.eq.s32.totalorder %s35_s6, 0  ;;  %s421_s8 = sshll.u32 %s139_s7, 7 }
  0x25   : > { %s435_s16 = sshll.u32 %s667_s13, 11  ;;  %s143_s26 = scalar_lea.vmem [#allocation2], %s421_s8 }
  0x26   : > { %s794_s15 = scalar_select %p38_p11, %s659_s11, %s40_s3  }
  0x27   : > { %s151_s24 = scalar_lea.hbm %s898_s0, %s435_s16  ;;  %s152_s27 = sshll.u32 %s143_s26, 4  ;;  %s153_s27 = int_to_ptr.vmem [resolvable:$true] %s152_s27 }
  0x28   : > { %p802_p2 = pnand %p474_p0, %p779_p12  ;;  %s140_s28 = scalar_lea.sflag [#allocation3], %s139_s7 }
  0x29   : > { %s572_s29 = scalar_lea.vmem %s153_s27, 2048  ;;  %s676_s30 = smov [#allocation2]  }
  0x2a   : > { %p561_p3 = pneg %p802_p2  ;;  %p573_p5 = scmp.ne.s32.totalorder %s153_s27, %s572_s29 }
  0x2b   : > { %s577_s3 = sshll.u32 %s676_s30, 4  ;;  %s578_s3 = int_to_ptr.vmem [resolvable:$false] %s577_s3 }
  0x2c   : > { %p575_p7 = pnand %p573_p5, %p561_p3  ;;  %s579_s6 = scalar_lea.vmem %s578_s3, 4096 }
  0x2d   : > { %p580_p4 = scmp.lt.s32.totalorder %s153_s27, %s578_s3  ;;  %p581_p9 = scmp.lt.s32.totalorder %s579_s6, %s572_s29 }
  0x2e   : > { %p576_p6 = pneg %p575_p7 }
  0x2f   : > { %p582_p11 = por %p581_p9, %p580_p4 }
  0x31   : > { %p583_p10 = pnand %p582_p11, %p576_p6 }
  0x33   : > { %586 = shalt.err (!%p583_p10)
}
  0x34   : > { %s677_s4 = smov 256   ;;  %s678_s8 = smov 16  }
  0x35   : > { %468 = dma.hbm_to_vmem [thread:$0]  (!%p802_p2), %s151_s24, 2048, %s153_s27, %s140_s28, %s677_s4, %s677_s4, %s678_s8  }
  0x36   : > { %164 = sbr.rel (%p752_p8) target bundleno = 289 (0x121), region = 28  ;;  %s813_s7 = sand.u32 (!%p752_p8), 1, %s655_s10  }
  0x37   : > { %s425_s16 = sshll.u32 (!%p752_p8), %s813_s7, 7  ;;  %s167_s22 = scalar_lea.sflag (!%p752_p8), [#allocation3], %s813_s7 }
  0x38   : > { %s817_s23 = scalar_lea.vmem (!%p752_p8), [#allocation2], %s425_s16  ;;  %p911_p12 = scmp.ne.s32.totalorder (!%p752_p8), %s904_s19, 0 }
  0x3b   : > { %638 = dma.done.wait (%p911_p12), %s167_s22, 2048  }
  0x3c   : > { %640 = vsyncadd (%p911_p12), %s167_s22, 4294965248 }
  0x3d   : > { %642 = dma.done.wait (%p732_p1), [#allocation6], 256  }
  0x3e   : > { %644 = vsyncadd (%p732_p1), [#allocation6], 4294967040  ;;  %v679_v0 = vmov 0.0   ;;  %v214_v1 = vld [vmem:[%s817_s23 + $0x78] sm:$0xff]  ;;  %v213_v2 = vld [vmem:[%s817_s23 + $0x70] sm:$0xff]  ;;  %vm215_vm0 = vcmask 523264  }
  0x3f   : > { %286 = vmatprep.mubr.f32.mxu0 %v679_v0  ;;  %292 = vmatprep.mubr.f32.mxu1 %v679_v0  ;;  %v212_v3 = vld [vmem:[%s817_s23 + $0x68] sm:$0xff]  ;;  %v211_v4 = vld [vmem:[%s817_s23 + $0x60] sm:$0xff]  ;;  %v210_v5 = vld [vmem:[%s817_s23 + $0x58] sm:$0xff]  ;;  %s427_s17 = sshll.u32 %s813_s7, 5  ;;  %s436_s24 = sshll.u32 %s663_s12, 9 }
  0x40   : > { %238 = vmatprep.subr.mxu0 %v214_v1  ;;  %437 = vmatprep.subr.mxu1 %v214_v1  ;;  %v209_v6 = vld [vmem:[%s817_s23 + $0x50] sm:$0xff]  ;;  %v208_v7 = vld [vmem:[%s817_s23 + $0x48] sm:$0xff]  ;;  %v207_v8 = vld [vmem:[%s817_s23 + $0x40] sm:$0xff]  ;;  %s194_s19 = scalar_lea.vmem [#allocation7], %s427_s17  ;;  %s850_s18 = scalar_lea.hbm %s900_s2, %s436_s24 }
  0x41   : > { %239 = vmatpush1.msra.mxu0 %v213_v2  ;;  %445 = vmatpush1.msra.mxu1 %v213_v2  ;;  %v206_v9 = vld [vmem:[%s817_s23 + $0x38] sm:$0xff]  ;;  %v205_v10 = vld [vmem:[%s817_s23 + $0x30] sm:$0xff]  ;;  %v204_v11 = vld [vmem:[%s817_s23 + $0x28] sm:$0xff]  ;;  %s319_s21 = sshll.u32 %s194_s19, 4  ;;  %s304_s28 = scalar_lea.sflag [#allocation4], %s813_s7  ;;  %s845_s21 = int_to_ptr.vmem [resolvable:$true] %s319_s21 }
  0x42   : > { %240 = vmatprep.subr.mxu0 %v212_v3  ;;  %438 = vmatprep.subr.mxu1 %v212_v3  ;;  %v203_v12 = vld [vmem:[%s817_s23 + $0x20] sm:$0xff]  ;;  %v202_v13 = vld [vmem:[%s817_s23 + $0x18] sm:$0xff]  ;;  %v201_v14 = vld [vmem:[%s817_s23 + $0x10] sm:$0xff]  ;;  %s587_s12 = scalar_lea.vmem %s845_s21, 512  ;;  %s680_s29 = smov [#allocation7]  }
  0x43   : > { %241 = vmatpush1.msra.mxu0 %v211_v4  ;;  %446 = vmatpush1.msra.mxu1 %v211_v4  ;;  %v200_v15 = vld [vmem:[%s817_s23 + $0x8] sm:$0xff]  ;;  %v199_v16 = vld [vmem:[%s817_s23] sm:$0xff]  ;;  %p588_p1 = scmp.ne.s32.totalorder %s845_s21, %s587_s12  ;;  %s591_s30 = sshll.u32 %s680_s29, 4  ;;  %s592_s30 = int_to_ptr.vmem [resolvable:$false] %s591_s30 }
  0x44   : > { %242 = vmatprep.subr.mxu0 %v210_v5  ;;  %439 = vmatprep.subr.mxu1 %v210_v5  ;;  %v197_v17 = vld [vmem:[#allocation5] sm:$0xff]  ;;  %v198_v18 = vld [vmem:[#allocation5 + $0x8] sm:$0xff]  ;;  %s593_s3 = scalar_lea.vmem %s592_s30, 1024  ;;  %p594_p0 = scmp.lt.s32.totalorder %s845_s21, %s592_s30 }
  0x45   : > { %243 = vmatpush1.msra.mxu0 %v209_v6  ;;  %447 = vmatpush1.msra.mxu1 %v209_v6  ;;  %p589_p8 = pnand %p588_p1, %p785_p13  ;;  %p595_p2 = scmp.lt.s32.totalorder %s593_s3, %s587_s12 }
  0x46   : > { %244 = vmatprep.subr.mxu0 %v208_v7  ;;  %440 = vmatprep.subr.mxu1 %v208_v7 }
  0x47   : > { %245 = vmatpush1.msra.mxu0 %v207_v8  ;;  %448 = vmatpush1.msra.mxu1 %v207_v8  ;;  %p590_p10 = pneg %p589_p8  ;;  %p596_p3 = por %p595_p2, %p594_p0 }
  0x48   : > { %246 = vmatprep.subr.mxu0 %v206_v9  ;;  %441 = vmatprep.subr.mxu1 %v206_v9 }
  0x49   : > { %247 = vmatpush1.msra.mxu0 %v205_v10  ;;  %449 = vmatpush1.msra.mxu1 %v205_v10  ;;  %p597_p5 = pnand %p596_p3, %p590_p10 }
  0x4a   : > { %248 = vmatprep.subr.mxu0 %v204_v11  ;;  %442 = vmatprep.subr.mxu1 %v204_v11 }
  0x4b   : > { %249 = vmatpush1.msra.mxu0 %v203_v12  ;;  %450 = vmatpush1.msra.mxu1 %v203_v12 }
  0x4c   : > { %250 = vmatprep.subr.mxu0 %v202_v13  ;;  %443 = vmatprep.subr.mxu1 %v202_v13 }
  0x4d   : > { %251 = vmatpush1.msra.mxu0 %v201_v14  ;;  %451 = vmatpush1.msra.mxu1 %v201_v14 }
  0x4e   : > { %252 = vmatprep.subr.mxu0 %v200_v15  ;;  %444 = vmatprep.subr.mxu1 %v200_v15 }
  0x4f   : > { %253 = vmatpush1.msra.mxu0 %v199_v16  ;;  %452 = vmatpush1.msra.mxu1 %v199_v16 }
  0x50   : > { %428 = vmatmul.mubr.msk.f32.vlgmr.msra.gmra.mxu0 %vm215_vm0, %v197_v17  ;;  %429 = vmatmul.mubr.msk.f32.vlgmr.msra.gmra.mxu1 %vm215_vm0, %v198_v18 }
 0x110   : > { %v288_v19 = vpop.f32.mrf.mxu0  ;;  %v294_v20 = vpop.f32.mrf.mxu1 }
 0x111   : > { %299 = vst [vmem:[%s194_s19] sm:$0xff] %v288_v19  ;;  %301 = vst [vmem:[%s194_s19 + $0x10] sm:$0xff] %v294_v20 }
 0x112   : > { %v290_v21 = vpop.f32.mrf.mxu0  ;;  %v296_v22 = vpop.f32.mrf.mxu1 }
 0x113   : > { %300 = vst [vmem:[%s194_s19 + $0x8] sm:$0xff] %v290_v21  ;;  %302 = vst [vmem:[%s194_s19 + $0x18] sm:$0xff] %v296_v22 }
 0x114   : > { %600 = shalt.err (!%p597_p5)
}
 0x115   : > { %s601_s6 = scalar_lea.hbm %s850_s18, 512  ;;  %s605_s16 = scalar_lea.hbm %s900_s2, 1024 }
 0x116   : > { %p602_p7 = scmp.ne.s32.totalorder %s850_s18, %s601_s6  ;;  %p606_p9 = scmp.lt.s32.totalorder %s850_s18, %s900_s2 }
 0x117   : > { %p607_p11 = scmp.lt.s32.totalorder %s605_s16, %s601_s6 }
 0x118   : > { %p603_p6 = pnand %p602_p7, %p785_p13 }
 0x119   : > { %p608_p12 = por %p607_p11, %p606_p9 }
 0x11a   : > { %p604_p4 = pneg %p603_p6 }
 0x11c   : > { %p609_p1 = pnand %p608_p12, %p604_p4 }
 0x11e   : > { %612 = shalt.err (!%p609_p1)
}
 0x11f   : > { %s681_s17 = smov 256   ;;  %s682_s19 = smov 16  }
 0x120   : > { %459 = dma.vmem_to_hbm [thread:$0]  (%p785_p13), %s845_s21, 512, %s850_s18, %s304_s28, %s681_s17, %s681_s17, %s682_s19  }
 0x121 PF: > { %s334_s24 = sand.u32 1, %s651_s9   ;;  %p912_p8 = scmp.ne.s32.totalorder %s905_s20, 0 }
 0x122   : > { %p913_p10 = scmp.ge.s32.totalorder %s671_s14, 2  ;;  %s335_s26 = scalar_lea.sflag [#allocation4], %s334_s24 }
 0x124   : > { %p470_p0 = pnand %p913_p10, %p912_p8 }
 0x126   : > { %p471_p2 = pneg %p470_p0 }
 0x128   : > { %646 = dma.done.wait (%p471_p2), %s335_s26, 512  }
 0x129   : > { %648 = vsyncadd (%p471_p2), %s335_s26, 4294966784  ;;  %s19_s14 = sadd.s32 1, %s671_s14   ;;  %s914_s9 = smov %s655_s10 }
 0x12a   : > { %p16_p3 = scmp.ge.s32.totalorder %s19_s14, 4   ;;  %s915_s10 = smov %s659_s11 }
 0x12b   : > { %s916_s11 = smov %s794_s15  ;;  %s917_s12 = smov %s667_s13 }
 0x12c   : > { %s918_s13 = smov %s920_s25  ;;  %18 = sbr.rel (!%p16_p3) target bundleno = 7 (0x7), region = 77 }
 0x131   :  { %340 = vsyncpa [#allocation3], 1 }
 0x132   :  { %342 = vsyncpa [#allocation3 + $0x1], 1 }
 0x133   :  { %343 = vsyncpa [#allocation6], 1 }
 0x134   :  { %344 = vsyncpa [#allocation4], 1 }
 0x135   :  { %346 = vsyncpa [#allocation4 + $0x1], 1 }

</bundles_post_ra>
